<compile_context>
chip_gen: v7x
topology: tpu7x:2x2x1
jax: 0.10.0
libtpu: 0.0.40
codegen_flags: <defaults>
</compile_context>

<pallas_src>
import functools

import jax
import jax.numpy as jnp
from jax.experimental import pallas as pl
from jax.experimental.pallas import tpu as pltpu


def _seg_loss_tile_kernel(pred_ref, teacher_ref, *out_refs,
                          compute_ce, compute_dice):
    """One (B, C, tile_rows, 128) tile -> lane-dense per-tile partial sums."""
    B, C, R, L = pred_ref.shape            # L == 128, R % 8 == 0
    f32 = jnp.float32

    idx = 0
    ce_ref = dice_ref = None
    if compute_ce:
        ce_ref = out_refs[idx]
        idx += 1
    if compute_dice:
        dice_ref = out_refs[idx]
        idx += 1
        n_valid = 3 * C * B
        P = dice_ref.shape[1]
        if P > n_valid:                    # zero the sublane-padding rows once
            dice_ref[0, n_valid:P, :] = jnp.zeros((P - n_valid, L), f32)

    # ---- Pass 1: channel maxes (input dtype, exact) + fused Dice partials ----
    m_nat = None
    tmax_nat = None
    for c in range(C):
        p_nat = pred_ref[:, c, :, :]       # (B, R, 128), input dtype
        t_nat = teacher_ref[:, c, :, :]
        if compute_ce:
            m_nat = p_nat if m_nat is None else jnp.maximum(m_nat, p_nat)
            tmax_nat = t_nat if tmax_nat is None else jnp.maximum(tmax_nat, t_nat)
        if compute_dice:
            p_f = p_nat.astype(f32)
            t_f = t_nat.astype(f32)
            # Reduce over the sublane (row) axis only; lanes stay live so the
            # cross-lane sum is deferred to the wrapper (no in-kernel XLU
            # cross-lane reduces, output block stays lane-dense).
            inter_rows = jnp.sum(p_f * t_f, axis=1)        # (B, 128)
            psum_rows = jnp.sum(p_f, axis=1)               # (B, 128)
            tsum_rows = jnp.sum(t_f, axis=1)               # (B, 128)
            base = c * B
            dice_ref[0, 0 * C * B + base:0 * C * B + base + B, :] = inter_rows
            dice_ref[0, 1 * C * B + base:1 * C * B + base + B, :] = psum_rows
            dice_ref[0, 2 * C * B + base:2 * C * B + base + B, :] = tsum_rows

    # ---- Pass 2 (CE): exp-sum + first-occurrence target-logit select --------
    if compute_ce:
        m = m_nat.astype(f32)
        s = None
        tgt = None
        # Reverse channel order: the last write wins at the smallest matching
        # channel, i.e. torch/jnp first-occurrence argmax, with no `found` mask.
        for c in reversed(range(C)):
            p_f = pred_ref[:, c, :, :].astype(f32)
            t_nat = teacher_ref[:, c, :, :]
            e = jnp.exp(p_f - m)
            s = e if s is None else s + e
            if tgt is None:
                tgt = p_f                  # correct: any earlier (smaller c)
            else:                          # tie overwrites it below.
                tgt = jnp.where(t_nat == tmax_nat, p_f, tgt)

        ce_pix = (m + jnp.log(s)) - tgt    # (B, R, 128) per-pixel CE
        acc = jnp.sum(ce_pix, axis=0)      # (R, 128): vreg adds over batch
        # Fold rows 8 at a time (pure VPU vreg adds, no cross-lane reduce) into
        # a single lane-dense (8, 128) partial-sum block.
        part = acc[0:8, :]
        for g in range(1, R // 8):
            part = part + acc[g * 8:(g + 1) * 8, :]
        ce_ref[0, :, :] = part


def _round_up(x, m):
    return ((x + m - 1) // m) * m


def _vmem_config():
    """Generation-aware scoped-VMEM limit and tile-sizing budget (bytes)."""
    phys = 64 * 1024 * 1024                # conservative default: v7x physical
    try:
        phys = int(pltpu.get_tpu_info().vmem_capacity_bytes)
    except Exception:
        pass
    # ~48 MiB on v7x (64 MiB physical), ~96 MiB on v5e/v6e (128 MiB physical).
    limit = max(16 * 1024 * 1024, min(phys * 3 // 4, 96 * 1024 * 1024))
    budget = limit * 7 // 10               # headroom for outputs / internal scratch
    return limit, budget


def _pick_tile_rows(B, C, rows, isz_p, isz_t, sub, budget_bytes,
                    min_tiles, max_tile_hw):
    """Largest multiple-of-`sub` row count dividing `rows` whose VMEM footprint
    (double-buffered inputs + f32 working set) fits the budget, shrunk further
    so there are at least `min_tiles` grid steps when the image allows it."""
    # Per 128-pixel row resident in VMEM:
    #   inputs : 2 pipeline buffers x B x C x 128 x (pred + teacher itemsize)
    #   working: ~8 live f32 (B, R, 128) temporaries (m, tmax, s, tgt, slabs, ce)
    bytes_per_row = 128 * B * (2 * C * (isz_p + isz_t) + 8 * 4)
    cap = max(sub, (budget_bytes // bytes_per_row) // sub * sub)
    if max_tile_hw is not None:
        cap = min(cap, max(sub, (max_tile_hw // (128 * sub)) * sub))
    if min_tiles and min_tiles > 1:
        cap = min(cap, max(sub, (rows // min_tiles) // sub * sub))
    cap = min(cap, rows)
    r = cap
    while r > sub:
        if rows % r == 0:
            return r
        r -= sub
    return sub                              # rows % sub == 0 by construction


def segmentation_typed_loss(pred, teacher, loss_type="ce+dice", smooth=1.0,
                            max_tile_hw=None, min_tiles=4):
    """pred, teacher: (B, C, H, W).  Returns the scalar float32 loss."""
    assert pred.ndim == 4 and teacher.ndim == 4
    assert pred.shape == teacher.shape
    loss_type = loss_type.lower()
    assert loss_type in ("ce+dice", "dice", "ce")
    compute_ce = "ce" in loss_type
    compute_dice = "dice" in loss_type

    B, C, H, W = pred.shape
    HW = H * W
    isz_p = jnp.dtype(pred.dtype).itemsize
    isz_t = jnp.dtype(teacher.dtype).itemsize
    # Dtype-aware sublane granularity (8 for f32, 16 for bf16, 32 for int8) so
    # chosen blocks carry no hidden sublane padding in VMEM.
    sub = 8 * max(1, 4 // min(isz_p, isz_t))

    # Pad HW so every tile is exactly (sub, 128)-aligned.  Padded pixels add
    # exactly B*n_pad*log(C) to the CE sum (corrected below) and 0 to Dice.
    HW_pad = _round_up(HW, 128 * sub)
    rows = HW_pad // 128
    n_pad = HW_pad - HW

    pred_r = pred.reshape(B, C, HW)
    teacher_r = teacher.reshape(B, C, HW)
    if n_pad:
        pred_r = jnp.pad(pred_r, ((0, 0), (0, 0), (0, n_pad)))
        teacher_r = jnp.pad(teacher_r, ((0, 0), (0, 0), (0, n_pad)))
    pred4 = pred_r.reshape(B, C, rows, 128)
    teacher4 = teacher_r.reshape(B, C, rows, 128)

    vmem_limit, vmem_budget = _vmem_config()
    tile_rows = _pick_tile_rows(B, C, rows, isz_p, isz_t, sub, vmem_budget,
                                min_tiles, max_tile_hw)
    num_tiles = rows // tile_rows

    in_specs = [
        pl.BlockSpec((B, C, tile_rows, 128), lambda i: (0, 0, i, 0)),
        pl.BlockSpec((B, C, tile_rows, 128), lambda i: (0, 0, i, 0)),
    ]
    out_shapes = []
    out_specs = []
    if compute_ce:
        out_shapes.append(jax.ShapeDtypeStruct((num_tiles, 8, 128), jnp.float32))
        out_specs.append(pl.BlockSpec((1, 8, 128), lambda i: (i, 0, 0)))
    dice_rows = _round_up(3 * C * B, 8)
    if compute_dice:
        out_shapes.append(
            jax.ShapeDtypeStruct((num_tiles, dice_rows, 128), jnp.float32))
        out_specs.append(pl.BlockSpec((1, dice_rows, 128), lambda i: (i, 0, 0)))

    kernel = functools.partial(_seg_loss_tile_kernel,
                               compute_ce=compute_ce, compute_dice=compute_dice)

    outs = pl.pallas_call(
        kernel,
        out_shape=out_shapes,
        grid=(num_tiles,),
        in_specs=in_specs,
        out_specs=out_specs,
        compiler_params=pltpu.CompilerParams(
            dimension_semantics=("parallel",),
            vmem_limit_bytes=int(vmem_limit)),
    )(pred4, teacher4)

    # Tiny finalize in plain JAX: sum partials across tiles/lanes, divide once.
    total = jnp.float32(0.0)
    idx = 0
    if compute_ce:
        ce_sum = jnp.sum(outs[idx])
        idx += 1
        if n_pad:
            # Each padded pixel contributed exactly log(C); remove it.
            ce_sum = ce_sum - jnp.float32(B * n_pad) * jnp.log(jnp.float32(C))
        total = total + ce_sum / jnp.float32(B * HW)
    if compute_dice:
        d = jnp.sum(outs[idx], axis=(0, 2))[:3 * C * B].reshape(3, C * B)
        idx += 1
        inter, psum, tsum = d[0], d[1], d[2]
        total = total + jnp.mean(
            1.0 - (2.0 * inter + smooth) / (psum + tsum + smooth))
    return total


def _reference_loss(pred, teacher, loss_type="ce+dice", smooth=1.0):
    # Pure-JAX reference mirroring the PyTorch module.
    pred = pred.astype(jnp.float32)
    teacher = teacher.astype(jnp.float32)
    total = jnp.float32(0.0)
    if "ce" in loss_type:
        labels = jnp.argmax(teacher, axis=1)                   # (B, H, W)
        logp = jax.nn.log_softmax(pred, axis=1)                # (B, C, H, W)
        nll = -jnp.take_along_axis(logp, labels[:, None], axis=1)[:, 0]
        total = total + jnp.mean(nll)
    if "dice" in loss_type:
        inter = jnp.sum(pred * teacher, axis=(-1, -2))
        psum = jnp.sum(pred, axis=(-1, -2))
        tsum = jnp.sum(teacher, axis=(-1, -2))
        total = total + jnp.mean(
            1.0 - (2.0 * inter + smooth) / (psum + tsum + smooth))
    return total


if __name__ == "__main__":
    key = jax.random.PRNGKey(0)

    def make_inputs(B, C, H, W, dtype=jnp.float32):
        kp, kt = jax.random.split(jax.random.fold_in(key, H * W + C))
        p = jax.random.normal(kp, (B, C, H, W), dtype=jnp.float32)
        t = jax.nn.softmax(
            jax.random.normal(kt, (B, C, H, W), dtype=jnp.float32) * 4.0, axis=1)
        return p.astype(dtype), t.astype(dtype)

    # Canonical small shape (B=2, C=4, 16x16): single padded tile (256 -> 1024
    # pixels), exercising the exact CE padding correction.
    pred, teacher = make_inputs(2, 4, 16, 16)
    for lt in ("ce+dice", "ce", "dice"):
        ref = _reference_loss(pred, teacher, loss_type=lt)
        out = jax.block_until_ready(
            segmentation_typed_loss(pred, teacher, loss_type=lt))
        assert jnp.allclose(out, ref, rtol=1e-4, atol=1e-4), (lt, out, ref)

    # Non-128-aligned image forced onto a multi-tile grid (padding + partials).
    pred, teacher = make_inputs(2, 4, 50, 50)
    for lt in ("ce+dice", "ce", "dice"):
        ref = _reference_loss(pred, teacher, loss_type=lt)
        out = jax.block_until_ready(
            segmentation_typed_loss(pred, teacher, loss_type=lt,
                                    max_tile_hw=1024))
        assert jnp.allclose(out, ref, rtol=1e-4, atol=1e-4), (lt, out, ref)

    # bf16 activations: streamed from HBM at bf16 width, maxed/compared in
    # bf16 (exact), accumulated in f32; default (multi-tile) tiling.
    pred_bf, teacher_bf = make_inputs(2, 4, 64, 64, dtype=jnp.bfloat16)
    ref_bf = _reference_loss(pred_bf, teacher_bf, loss_type="ce+dice")
    out_bf = jax.block_until_ready(
        segmentation_typed_loss(pred_bf, teacher_bf, loss_type="ce+dice"))
    assert jnp.allclose(out_bf, ref_bf, rtol=2e-3, atol=2e-3), (out_bf, ref_bf)

    print("KERNEL_OK")
</pallas_src>

<mosaic_0001>
module attributes {stable_mosaic.version = 11 : i64} {
  func.func @_seg_loss_tile_kernel(%arg0: i32, %arg1: memref<2x4x8x128xf32, #tpu.memory_space<vmem>>, %arg2: memref<2x4x8x128xf32, #tpu.memory_space<vmem>>, %arg3: memref<1x8x128xf32, #tpu.memory_space<vmem>>, %arg4: memref<1x24x128xf32, #tpu.memory_space<vmem>>) attributes {dimension_semantics = [#tpu.dimension_semantics<parallel>], iteration_bounds = array<i64: 1>, scalar_prefetch = 0 : i64, scratch_operands = 0 : i64, tpu.core_type = #tpu.core_type<tc>, window_params = [{transform_indices = @transform_0, window_bounds = array<i64: 2, 4, 8, 128>}, {transform_indices = @transform_1, window_bounds = array<i64: 2, 4, 8, 128>}, {transform_indices = @transform_2, window_bounds = array<i64: 1, 8, 128>}, {transform_indices = @transform_3, window_bounds = array<i64: 1, 24, 128>}]} {
    %c0 = arith.constant 0 : index
    %c0_0 = arith.constant 0 : index
    %c0_1 = arith.constant 0 : index
    %c0_2 = arith.constant 0 : index
    %0 = vector.load %arg1[%c0, %c0_0, %c0_1, %c0_2] : memref<2x4x8x128xf32, #tpu.memory_space<vmem>>, vector<2x1x8x128xf32>
    %1 = vector.shape_cast %0 : vector<2x1x8x128xf32> to vector<2x8x128xf32>
    %c0_3 = arith.constant 0 : index
    %c0_4 = arith.constant 0 : index
    %c0_5 = arith.constant 0 : index
    %c0_6 = arith.constant 0 : index
    %2 = vector.load %arg2[%c0_3, %c0_4, %c0_5, %c0_6] : memref<2x4x8x128xf32, #tpu.memory_space<vmem>>, vector<2x1x8x128xf32>
    %3 = vector.shape_cast %2 : vector<2x1x8x128xf32> to vector<2x8x128xf32>
    %4 = arith.mulf %1, %3 : vector<2x8x128xf32>
    %cst = arith.constant dense<0.000000e+00> : vector<2x128xf32>
    %5 = vector.multi_reduction <add>, %4, %cst [1] : vector<2x8x128xf32> to vector<2x128xf32>
    %cst_7 = arith.constant dense<0.000000e+00> : vector<2x128xf32>
    %6 = vector.multi_reduction <add>, %1, %cst_7 [1] : vector<2x8x128xf32> to vector<2x128xf32>
    %cst_8 = arith.constant dense<0.000000e+00> : vector<2x128xf32>
    %7 = vector.multi_reduction <add>, %3, %cst_8 [1] : vector<2x8x128xf32> to vector<2x128xf32>
    %c0_9 = arith.constant 0 : index
    %c0_10 = arith.constant 0 : index
    %c0_11 = arith.constant 0 : index
    %8 = vector.load %arg4[%c0_9, %c0_10, %c0_11] : memref<1x24x128xf32, #tpu.memory_space<vmem>>, vector<1x2x128xf32>
    %9 = vector.shape_cast %8 : vector<1x2x128xf32> to vector<2x128xf32>
    %10 = vector.shape_cast %5 : vector<2x128xf32> to vector<1x2x128xf32>
    tpu.vector_store %arg4[%c0_9, %c0_10, %c0_11], %10 {strides = array<i32>} : memref<1x24x128xf32, #tpu.memory_space<vmem>>, vector<1x2x128xf32>,
    %c0_12 = arith.constant 0 : index
    %c8 = arith.constant 8 : index
    %c0_13 = arith.constant 0 : index
    %11 = vector.load %arg4[%c0_12, %c8, %c0_13] : memref<1x24x128xf32, #tpu.memory_space<vmem>>, vector<1x2x128xf32>
    %12 = vector.shape_cast %11 : vector<1x2x128xf32> to vector<2x128xf32>
    %13 = vector.shape_cast %6 : vector<2x128xf32> to vector<1x2x128xf32>
    tpu.vector_store %arg4[%c0_12, %c8, %c0_13], %13 {strides = array<i32>} : memref<1x24x128xf32, #tpu.memory_space<vmem>>, vector<1x2x128xf32>,
    %c0_14 = arith.constant 0 : index
    %c16 = arith.constant 16 : index
    %c0_15 = arith.constant 0 : index
    %14 = vector.load %arg4[%c0_14, %c16, %c0_15] : memref<1x24x128xf32, #tpu.memory_space<vmem>>, vector<1x2x128xf32>
    %15 = vector.shape_cast %14 : vector<1x2x128xf32> to vector<2x128xf32>
    %16 = vector.shape_cast %7 : vector<2x128xf32> to vector<1x2x128xf32>
    tpu.vector_store %arg4[%c0_14, %c16, %c0_15], %16 {strides = array<i32>} : memref<1x24x128xf32, #tpu.memory_space<vmem>>, vector<1x2x128xf32>,
    %c0_16 = arith.constant 0 : index
    %c1 = arith.constant 1 : index
    %c0_17 = arith.constant 0 : index
    %c0_18 = arith.constant 0 : index
    %17 = vector.load %arg1[%c0_16, %c1, %c0_17, %c0_18] : memref<2x4x8x128xf32, #tpu.memory_space<vmem>>, vector<2x1x8x128xf32>
    %18 = vector.shape_cast %17 : vector<2x1x8x128xf32> to vector<2x8x128xf32>
    %c0_19 = arith.constant 0 : index
    %c1_20 = arith.constant 1 : index
    %c0_21 = arith.constant 0 : index
    %c0_22 = arith.constant 0 : index
    %19 = vector.load %arg2[%c0_19, %c1_20, %c0_21, %c0_22] : memref<2x4x8x128xf32, #tpu.memory_space<vmem>>, vector<2x1x8x128xf32>
    %20 = vector.shape_cast %19 : vector<2x1x8x128xf32> to vector<2x8x128xf32>
    %21 = arith.maximumf %1, %18 : vector<2x8x128xf32>
    %22 = arith.maximumf %3, %20 : vector<2x8x128xf32>
    %23 = arith.mulf %18, %20 : vector<2x8x128xf32>
    %cst_23 = arith.constant dense<0.000000e+00> : vector<2x128xf32>
    %24 = vector.multi_reduction <add>, %23, %cst_23 [1] : vector<2x8x128xf32> to vector<2x128xf32>
    %cst_24 = arith.constant dense<0.000000e+00> : vector<2x128xf32>
    %25 = vector.multi_reduction <add>, %18, %cst_24 [1] : vector<2x8x128xf32> to vector<2x128xf32>
    %cst_25 = arith.constant dense<0.000000e+00> : vector<2x128xf32>
    %26 = vector.multi_reduction <add>, %20, %cst_25 [1] : vector<2x8x128xf32> to vector<2x128xf32>
    %c0_26 = arith.constant 0 : index
    %c2 = arith.constant 2 : index
    %c0_27 = arith.constant 0 : index
    %27 = vector.load %arg4[%c0_26, %c2, %c0_27] : memref<1x24x128xf32, #tpu.memory_space<vmem>>, vector<1x2x128xf32>
    %28 = vector.shape_cast %27 : vector<1x2x128xf32> to vector<2x128xf32>
    %29 = vector.shape_cast %24 : vector<2x128xf32> to vector<1x2x128xf32>
    tpu.vector_store %arg4[%c0_26, %c2, %c0_27], %29 {strides = array<i32>} : memref<1x24x128xf32, #tpu.memory_space<vmem>>, vector<1x2x128xf32>,
    %c0_28 = arith.constant 0 : index
    %c10 = arith.constant 10 : index
    %c0_29 = arith.constant 0 : index
    %30 = vector.load %arg4[%c0_28, %c10, %c0_29] : memref<1x24x128xf32, #tpu.memory_space<vmem>>, vector<1x2x128xf32>
    %31 = vector.shape_cast %30 : vector<1x2x128xf32> to vector<2x128xf32>
    %32 = vector.shape_cast %25 : vector<2x128xf32> to vector<1x2x128xf32>
    tpu.vector_store %arg4[%c0_28, %c10, %c0_29], %32 {strides = array<i32>} : memref<1x24x128xf32, #tpu.memory_space<vmem>>, vector<1x2x128xf32>,
    %c0_30 = arith.constant 0 : index
    %c18 = arith.constant 18 : index
    %c0_31 = arith.constant 0 : index
    %33 = vector.load %arg4[%c0_30, %c18, %c0_31] : memref<1x24x128xf32, #tpu.memory_space<vmem>>, vector<1x2x128xf32>
    %34 = vector.shape_cast %33 : vector<1x2x128xf32> to vector<2x128xf32>
    %35 = vector.shape_cast %26 : vector<2x128xf32> to vector<1x2x128xf32>
    tpu.vector_store %arg4[%c0_30, %c18, %c0_31], %35 {strides = array<i32>} : memref<1x24x128xf32, #tpu.memory_space<vmem>>, vector<1x2x128xf32>,
    %c0_32 = arith.constant 0 : index
    %c2_33 = arith.constant 2 : index
    %c0_34 = arith.constant 0 : index
    %c0_35 = arith.constant 0 : index
    %36 = vector.load %arg1[%c0_32, %c2_33, %c0_34, %c0_35] : memref<2x4x8x128xf32, #tpu.memory_space<vmem>>, vector<2x1x8x128xf32>
    %37 = vector.shape_cast %36 : vector<2x1x8x128xf32> to vector<2x8x128xf32>
    %c0_36 = arith.constant 0 : index
    %c2_37 = arith.constant 2 : index
    %c0_38 = arith.constant 0 : index
    %c0_39 = arith.constant 0 : index
    %38 = vector.load %arg2[%c0_36, %c2_37, %c0_38, %c0_39] : memref<2x4x8x128xf32, #tpu.memory_space<vmem>>, vector<2x1x8x128xf32>
    %39 = vector.shape_cast %38 : vector<2x1x8x128xf32> to vector<2x8x128xf32>
    %40 = arith.maximumf %21, %37 : vector<2x8x128xf32>
    %41 = arith.maximumf %22, %39 : vector<2x8x128xf32>
    %42 = arith.mulf %37, %39 : vector<2x8x128xf32>
    %cst_40 = arith.constant dense<0.000000e+00> : vector<2x128xf32>
    %43 = vector.multi_reduction <add>, %42, %cst_40 [1] : vector<2x8x128xf32> to vector<2x128xf32>
    %cst_41 = arith.constant dense<0.000000e+00> : vector<2x128xf32>
    %44 = vector.multi_reduction <add>, %37, %cst_41 [1] : vector<2x8x128xf32> to vector<2x128xf32>
    %cst_42 = arith.constant dense<0.000000e+00> : vector<2x128xf32>
    %45 = vector.multi_reduction <add>, %39, %cst_42 [1] : vector<2x8x128xf32> to vector<2x128xf32>
    %c0_43 = arith.constant 0 : index
    %c4 = arith.constant 4 : index
    %c0_44 = arith.constant 0 : index
    %46 = vector.load %arg4[%c0_43, %c4, %c0_44] : memref<1x24x128xf32, #tpu.memory_space<vmem>>, vector<1x2x128xf32>
    %47 = vector.shape_cast %46 : vector<1x2x128xf32> to vector<2x128xf32>
    %48 = vector.shape_cast %43 : vector<2x128xf32> to vector<1x2x128xf32>
    tpu.vector_store %arg4[%c0_43, %c4, %c0_44], %48 {strides = array<i32>} : memref<1x24x128xf32, #tpu.memory_space<vmem>>, vector<1x2x128xf32>,
    %c0_45 = arith.constant 0 : index
    %c12 = arith.constant 12 : index
    %c0_46 = arith.constant 0 : index
    %49 = vector.load %arg4[%c0_45, %c12, %c0_46] : memref<1x24x128xf32, #tpu.memory_space<vmem>>, vector<1x2x128xf32>
    %50 = vector.shape_cast %49 : vector<1x2x128xf32> to vector<2x128xf32>
    %51 = vector.shape_cast %44 : vector<2x128xf32> to vector<1x2x128xf32>
    tpu.vector_store %arg4[%c0_45, %c12, %c0_46], %51 {strides = array<i32>} : memref<1x24x128xf32, #tpu.memory_space<vmem>>, vector<1x2x128xf32>,
    %c0_47 = arith.constant 0 : index
    %c20 = arith.constant 20 : index
    %c0_48 = arith.constant 0 : index
    %52 = vector.load %arg4[%c0_47, %c20, %c0_48] : memref<1x24x128xf32, #tpu.memory_space<vmem>>, vector<1x2x128xf32>
    %53 = vector.shape_cast %52 : vector<1x2x128xf32> to vector<2x128xf32>
    %54 = vector.shape_cast %45 : vector<2x128xf32> to vector<1x2x128xf32>
    tpu.vector_store %arg4[%c0_47, %c20, %c0_48], %54 {strides = array<i32>} : memref<1x24x128xf32, #tpu.memory_space<vmem>>, vector<1x2x128xf32>,
    %c0_49 = arith.constant 0 : index
    %c3 = arith.constant 3 : index
    %c0_50 = arith.constant 0 : index
    %c0_51 = arith.constant 0 : index
    %55 = vector.load %arg1[%c0_49, %c3, %c0_50, %c0_51] : memref<2x4x8x128xf32, #tpu.memory_space<vmem>>, vector<2x1x8x128xf32>
    %56 = vector.shape_cast %55 : vector<2x1x8x128xf32> to vector<2x8x128xf32>
    %c0_52 = arith.constant 0 : index
    %c3_53 = arith.constant 3 : index
    %c0_54 = arith.constant 0 : index
    %c0_55 = arith.constant 0 : index
    %57 = vector.load %arg2[%c0_52, %c3_53, %c0_54, %c0_55] : memref<2x4x8x128xf32, #tpu.memory_space<vmem>>, vector<2x1x8x128xf32>
    %58 = vector.shape_cast %57 : vector<2x1x8x128xf32> to vector<2x8x128xf32>
    %59 = arith.maximumf %40, %56 : vector<2x8x128xf32>
    %60 = arith.maximumf %41, %58 : vector<2x8x128xf32>
    %61 = arith.mulf %56, %58 : vector<2x8x128xf32>
    %cst_56 = arith.constant dense<0.000000e+00> : vector<2x128xf32>
    %62 = vector.multi_reduction <add>, %61, %cst_56 [1] : vector<2x8x128xf32> to vector<2x128xf32>
    %cst_57 = arith.constant dense<0.000000e+00> : vector<2x128xf32>
    %63 = vector.multi_reduction <add>, %56, %cst_57 [1] : vector<2x8x128xf32> to vector<2x128xf32>
    %cst_58 = arith.constant dense<0.000000e+00> : vector<2x128xf32>
    %64 = vector.multi_reduction <add>, %58, %cst_58 [1] : vector<2x8x128xf32> to vector<2x128xf32>
    %c0_59 = arith.constant 0 : index
    %c6 = arith.constant 6 : index
    %c0_60 = arith.constant 0 : index
    %65 = vector.load %arg4[%c0_59, %c6, %c0_60] : memref<1x24x128xf32, #tpu.memory_space<vmem>>, vector<1x2x128xf32>
    %66 = vector.shape_cast %65 : vector<1x2x128xf32> to vector<2x128xf32>
    %67 = vector.shape_cast %62 : vector<2x128xf32> to vector<1x2x128xf32>
    tpu.vector_store %arg4[%c0_59, %c6, %c0_60], %67 {strides = array<i32>} : memref<1x24x128xf32, #tpu.memory_space<vmem>>, vector<1x2x128xf32>,
    %c0_61 = arith.constant 0 : index
    %c14 = arith.constant 14 : index
    %c0_62 = arith.constant 0 : index
    %68 = vector.load %arg4[%c0_61, %c14, %c0_62] : memref<1x24x128xf32, #tpu.memory_space<vmem>>, vector<1x2x128xf32>
    %69 = vector.shape_cast %68 : vector<1x2x128xf32> to vector<2x128xf32>
    %70 = vector.shape_cast %63 : vector<2x128xf32> to vector<1x2x128xf32>
    tpu.vector_store %arg4[%c0_61, %c14, %c0_62], %70 {strides = array<i32>} : memref<1x24x128xf32, #tpu.memory_space<vmem>>, vector<1x2x128xf32>,
    %c0_63 = arith.constant 0 : index
    %c22 = arith.constant 22 : index
    %c0_64 = arith.constant 0 : index
    %71 = vector.load %arg4[%c0_63, %c22, %c0_64] : memref<1x24x128xf32, #tpu.memory_space<vmem>>, vector<1x2x128xf32>
    %72 = vector.shape_cast %71 : vector<1x2x128xf32> to vector<2x128xf32>
    %73 = vector.shape_cast %64 : vector<2x128xf32> to vector<1x2x128xf32>
    tpu.vector_store %arg4[%c0_63, %c22, %c0_64], %73 {strides = array<i32>} : memref<1x24x128xf32, #tpu.memory_space<vmem>>, vector<1x2x128xf32>,
    %c0_65 = arith.constant 0 : index
    %c3_66 = arith.constant 3 : index
    %c0_67 = arith.constant 0 : index
    %c0_68 = arith.constant 0 : index
    %74 = vector.load %arg1[%c0_65, %c3_66, %c0_67, %c0_68] : memref<2x4x8x128xf32, #tpu.memory_space<vmem>>, vector<2x1x8x128xf32>
    %75 = vector.shape_cast %74 : vector<2x1x8x128xf32> to vector<2x8x128xf32>
    %76 = arith.subf %75, %59 : vector<2x8x128xf32>
    %77 = math.exp %76 : vector<2x8x128xf32>
    %c0_69 = arith.constant 0 : index
    %c2_70 = arith.constant 2 : index
    %c0_71 = arith.constant 0 : index
    %c0_72 = arith.constant 0 : index
    %78 = vector.load %arg1[%c0_69, %c2_70, %c0_71, %c0_72] : memref<2x4x8x128xf32, #tpu.memory_space<vmem>>, vector<2x1x8x128xf32>
    %79 = vector.shape_cast %78 : vector<2x1x8x128xf32> to vector<2x8x128xf32>
    %c0_73 = arith.constant 0 : index
    %c2_74 = arith.constant 2 : index
    %c0_75 = arith.constant 0 : index
    %c0_76 = arith.constant 0 : index
    %80 = vector.load %arg2[%c0_73, %c2_74, %c0_75, %c0_76] : memref<2x4x8x128xf32, #tpu.memory_space<vmem>>, vector<2x1x8x128xf32>
    %81 = vector.shape_cast %80 : vector<2x1x8x128xf32> to vector<2x8x128xf32>
    %82 = arith.subf %79, %59 : vector<2x8x128xf32>
    %83 = math.exp %82 : vector<2x8x128xf32>
    %84 = arith.addf %77, %83 : vector<2x8x128xf32>
    %85 = arith.cmpf oeq, %81, %60 : vector<2x8x128xf32>
    %86 = arith.select %85, %79, %75 : vector<2x8x128xi1>, vector<2x8x128xf32>
    %c0_77 = arith.constant 0 : index
    %c1_78 = arith.constant 1 : index
    %c0_79 = arith.constant 0 : index
    %c0_80 = arith.constant 0 : index
    %87 = vector.load %arg1[%c0_77, %c1_78, %c0_79, %c0_80] : memref<2x4x8x128xf32, #tpu.memory_space<vmem>>, vector<2x1x8x128xf32>
    %88 = vector.shape_cast %87 : vector<2x1x8x128xf32> to vector<2x8x128xf32>
    %c0_81 = arith.constant 0 : index
    %c1_82 = arith.constant 1 : index
    %c0_83 = arith.constant 0 : index
    %c0_84 = arith.constant 0 : index
    %89 = vector.load %arg2[%c0_81, %c1_82, %c0_83, %c0_84] : memref<2x4x8x128xf32, #tpu.memory_space<vmem>>, vector<2x1x8x128xf32>
    %90 = vector.shape_cast %89 : vector<2x1x8x128xf32> to vector<2x8x128xf32>
    %91 = arith.subf %88, %59 : vector<2x8x128xf32>
    %92 = math.exp %91 : vector<2x8x128xf32>
    %93 = arith.addf %84, %92 : vector<2x8x128xf32>
    %94 = arith.cmpf oeq, %90, %60 : vector<2x8x128xf32>
    %95 = arith.select %94, %88, %86 : vector<2x8x128xi1>, vector<2x8x128xf32>
    %c0_85 = arith.constant 0 : index
    %c0_86 = arith.constant 0 : index
    %c0_87 = arith.constant 0 : index
    %c0_88 = arith.constant 0 : index
    %96 = vector.load %arg1[%c0_85, %c0_86, %c0_87, %c0_88] : memref<2x4x8x128xf32, #tpu.memory_space<vmem>>, vector<2x1x8x128xf32>
    %97 = vector.shape_cast %96 : vector<2x1x8x128xf32> to vector<2x8x128xf32>
    %c0_89 = arith.constant 0 : index
    %c0_90 = arith.constant 0 : index
    %c0_91 = arith.constant 0 : index
    %c0_92 = arith.constant 0 : index
    %98 = vector.load %arg2[%c0_89, %c0_90, %c0_91, %c0_92] : memref<2x4x8x128xf32, #tpu.memory_space<vmem>>, vector<2x1x8x128xf32>
    %99 = vector.shape_cast %98 : vector<2x1x8x128xf32> to vector<2x8x128xf32>
    %100 = arith.subf %97, %59 : vector<2x8x128xf32>
    %101 = math.exp %100 : vector<2x8x128xf32>
    %102 = arith.addf %93, %101 : vector<2x8x128xf32>
    %103 = arith.cmpf oeq, %99, %60 : vector<2x8x128xf32>
    %104 = arith.select %103, %97, %95 : vector<2x8x128xi1>, vector<2x8x128xf32>
    %105 = math.log %102 : vector<2x8x128xf32>
    %106 = arith.addf %59, %105 : vector<2x8x128xf32>
    %107 = arith.subf %106, %104 : vector<2x8x128xf32>
    %cst_93 = arith.constant dense<0.000000e+00> : vector<8x128xf32>
    %108 = vector.multi_reduction <add>, %107, %cst_93 [0] : vector<2x8x128xf32> to vector<8x128xf32>
    %c0_94 = arith.constant 0 : index
    %c0_95 = arith.constant 0 : index
    %c0_96 = arith.constant 0 : index
    %109 = vector.load %arg3[%c0_94, %c0_95, %c0_96] : memref<1x8x128xf32, #tpu.memory_space<vmem>>, vector<1x8x128xf32>
    %110 = vector.shape_cast %109 : vector<1x8x128xf32> to vector<8x128xf32>
    %111 = vector.shape_cast %108 : vector<8x128xf32> to vector<1x8x128xf32>
    tpu.vector_store %arg3[%c0_94, %c0_95, %c0_96], %111 {strides = array<i32>} : memref<1x8x128xf32, #tpu.memory_space<vmem>>, vector<1x8x128xf32>,
    return
  }
  func.func @transform_0(%arg0: i32) -> (i32, i32, i32, i32) {
    %c0_i32 = arith.constant 0 : i32
    %c0_i32_0 = arith.constant 0 : i32
    %c0_i32_1 = arith.constant 0 : i32
    %c0_i32_2 = arith.constant 0 : i32
    return %c0_i32, %c0_i32_0, %arg0, %c0_i32_1 : i32, i32, i32, i32
  }
  func.func @transform_1(%arg0: i32) -> (i32, i32, i32, i32) {
    %c0_i32 = arith.constant 0 : i32
    %c0_i32_0 = arith.constant 0 : i32
    %c0_i32_1 = arith.constant 0 : i32
    %c0_i32_2 = arith.constant 0 : i32
    return %c0_i32, %c0_i32_0, %arg0, %c0_i32_1 : i32, i32, i32, i32
  }
  func.func @transform_2(%arg0: i32) -> (i32, i32, i32) {
    %c0_i32 = arith.constant 0 : i32
    %c0_i32_0 = arith.constant 0 : i32
    %c0_i32_1 = arith.constant 0 : i32
    return %arg0, %c0_i32, %c0_i32_0 : i32, i32, i32
  }
  func.func @transform_3(%arg0: i32) -> (i32, i32, i32) {
    %c0_i32 = arith.constant 0 : i32
    %c0_i32_0 = arith.constant 0 : i32
    %c0_i32_1 = arith.constant 0 : i32
    return %arg0, %c0_i32, %c0_i32_0 : i32, i32, i32
  }
}

</mosaic_0001>

<bundles_post_ra>
// kernel: tpu_custom_call.1
= control target key start
LH: loop header
LB: loop body
LE: loop exit
PB: predicated region body
PF: predicated region fallthrough
CT: control target
= control target key end

     0   :  { %9 = vsyncpa [#allocation3], 0  ;;  %s758_s0 = inlined_call_operand.hbm [shape: f32[2,4,8,128], index: 0, kind: input, shape index: {}]   ;;  %s759_s1 = inlined_call_operand.hbm [shape: f32[2,4,8,128], index: 1, kind: input, shape index: {}]   ;;  %s760_s2 = inlined_call_operand.hbm [shape: f32[1,8,128], index: 2, kind: output, shape index: {0}]   ;;  %s761_s3 = inlined_call_operand.hbm [shape: f32[1,24,128], index: 3, kind: output, shape index: {1}]  }
   0x1   :  { %10 = vsyncpa [#allocation6], 0 }
   0x2   :  { %11 = vsyncpa [#allocation4], 0 }
   0x3   :  { %12 = vsyncpa [#allocation9], 0  ;;  %s510_s12 = smov [#allocation2]   ;;  %s414_s16 = scalar_lea.hbm %s758_s0, 1024 }
   0x4   :  { %s18_s13 = sshll.u32 %s510_s12, 4  ;;  %p415_p0 = scmp.ne.s32.totalorder %s758_s0, %s414_s16  ;;  %s19_s13 = int_to_ptr.vmem [resolvable:$true] %s18_s13 }
   0x5   :  { %p418_p1 = scmp.lt.u32.totalorder %s414_s16, %s758_s0 }
   0x7   :  { %p420_p2 = pnand %p418_p1, %p415_p0 }
   0x9   :  { %423 = shalt.err (!%p420_p2)
}
   0xa   :  { %s424_s21 = scalar_lea.vmem %s19_s13, 1024  ;;  %p429_p4 = scmp.lt.s32.totalorder %s19_s13, %s19_s13 }
   0xb   :  { %p425_p3 = scmp.ne.s32.totalorder %s19_s13, %s424_s21  ;;  %p430_p5 = scmp.lt.s32.totalorder %s424_s21, %s424_s21 }
   0xd   :  { %p431_p6 = por %p430_p5, %p429_p4 }
   0xf   :  { %p432_p7 = pnand %p431_p6, %p425_p3 }
  0x11   :  { %435 = shalt.err (!%p432_p7)
}
  0x12   :  { %s511_s22 = smov 128   ;;  %s512_s23 = smov 8  }
  0x13   :  { %24 = dma.hbm_to_vmem [thread:$0]  %s758_s0, 1024, %s19_s13, [#allocation3], %s511_s22, %s511_s22, %s512_s23  }
  0x14   :  { %s513_s26 = smov [#allocation5]   ;;  %s436_s30 = scalar_lea.hbm %s759_s1, 1024 }
  0x15   :  { %s30_s27 = sshll.u32 %s513_s26, 4  ;;  %p437_p8 = scmp.ne.s32.totalorder %s759_s1, %s436_s30  ;;  %s31_s27 = int_to_ptr.vmem [resolvable:$true] %s30_s27 }
  0x16   :  { %p440_p9 = scmp.lt.u32.totalorder %s436_s30, %s759_s1 }
  0x18   :  { %p442_p10 = pnand %p440_p9, %p437_p8 }
  0x1a   :  { %445 = shalt.err (!%p442_p10)
}
  0x1b   :  { %s446_s8 = scalar_lea.vmem %s31_s27, 1024  ;;  %p451_p12 = scmp.lt.s32.totalorder %s31_s27, %s31_s27 }
  0x1c   :  { %p447_p11 = scmp.ne.s32.totalorder %s31_s27, %s446_s8  ;;  %p452_p13 = scmp.lt.s32.totalorder %s446_s8, %s446_s8 }
  0x1e   :  { %p453_p0 = por %p452_p13, %p451_p12 }
  0x20   :  { %p454_p1 = pnand %p453_p0, %p447_p11 }
  0x22   :  { %457 = shalt.err (!%p454_p1)
}
  0x23   :  { %36 = dma.hbm_to_vmem [thread:$0]  %s759_s1, 1024, %s31_s27, [#allocation6], %s511_s22, %s511_s22, %s512_s23  }
  0x24   :  { %502 = dma.done.wait [#allocation3], 1024  }
  0x25   :  { %503 = vsyncadd [#allocation3], 4294966272 }
  0x26   :  { %504 = dma.done.wait [#allocation6], 1024  }
  0x27   :  { %505 = vsyncadd [#allocation6], 4294966272  ;;  %v566_v0 = vld [vmem:[#allocation2] sm:$0xff]  ;;  %v579_v8 = vld [vmem:[#allocation2 + $0x8] sm:$0xff]  ;;  %vm87_vm0 = vcmask 1041409   ;;  %s514_s1 = smov [#allocation8]  }
  0x28   :  { %v568_v1 = vld [vmem:[#allocation2 + $0x20] sm:$0xff]  ;;  %v61_v5 = vrot.slane %v566_v0, 4  ;;  %v581_v9 = vld [vmem:[#allocation2 + $0x28] sm:$0xff]  ;;  %v107_v14 = vmax.f32 %v566_v0, %v579_v8  ;;  %v125_v58 = vrot.slane %v579_v8, 4  ;;  %v605_v60 = vld [vmem:[#allocation2 + $0x10] sm:$0xff]  ;;  %s371_s10 = sshll.u32 %s514_s1, 4  ;;  %s698_s10 = int_to_ptr.vmem [resolvable:$true] %s371_s10 }
  0x29   :  { %v570_v2 = vld [vmem:[#allocation5] sm:$0xff]  ;;  %v67_v6 = vrot.slane %v568_v1, 4  ;;  %v586_v12 = vld [vmem:[#allocation5 + $0x8] sm:$0xff]  ;;  %v108_v15 = vmax.f32 %v568_v1, %v581_v9  ;;  %v131_v59 = vrot.slane %v581_v9, 4  ;;  %s458_s11 = scalar_lea.vmem %s698_s10, 384  ;;  %p463_p3 = scmp.lt.s32.totalorder %s698_s10, %s698_s10 }
  0x2a   :  { %v572_v3 = vld [vmem:[#allocation5 + $0x20] sm:$0xff]  ;;  %v47_v4 = vmul.f32 %v570_v2, %v566_v0  ;;  %v73_v7 = vrot.slane %v570_v2, 4  ;;  %v588_v13 = vld [vmem:[#allocation5 + $0x28] sm:$0xff]  ;;  %v62_v17 = vadd.f32 %v61_v5, %v566_v0  ;;  %v111_v22 = vmul.f32 %v586_v12, %v579_v8  ;;  %p459_p2 = scmp.ne.s32.totalorder %s698_s10, %s458_s11  ;;  %p464_p4 = scmp.lt.s32.totalorder %s458_s11, %s458_s11 }
  0x2b   :  { %v48_v10 = vmul.f32 %v572_v3, %v568_v1  ;;  %v79_v11 = vrot.slane %v572_v3, 4  ;;  %v68_v18 = vadd.f32 %v67_v6, %v568_v1  ;;  %v112_v23 = vmul.f32 %v588_v13, %v581_v9 }
  0x2c   :  { %v49_v16 = vrot.slane %v47_v4, 4  ;;  %v74_v19 = vadd.f32 %v73_v7, %v570_v2  ;;  %v63_v25 = vrot.slane %v62_v17, 2  ;;  %v113_v30 = vrot.slane %v111_v22, 4  ;;  %p465_p5 = por %p464_p4, %p463_p3 }
  0x2d   :  { %v55_v20 = vrot.slane %v48_v10, 4  ;;  %v80_v21 = vadd.f32 %v79_v11, %v572_v3  ;;  %v69_v26 = vrot.slane %v68_v18, 2  ;;  %v119_v31 = vrot.slane %v112_v23, 4  ;;  %v612_v11 = vld [vmem:[#allocation2 + $0x30] sm:$0xff] }
  0x2e   :  { %v50_v24 = vadd.f32 %v49_v16, %v47_v4  ;;  %v75_v27 = vrot.slane %v74_v19, 2  ;;  %v64_v33 = vadd.f32 %v63_v25, %v62_v17  ;;  %v114_v38 = vadd.f32 %v113_v30, %v111_v22  ;;  %v614_v16 = vld [vmem:[#allocation5 + $0x10] sm:$0xff]  ;;  %p466_p6 = pnand %p465_p5, %p459_p2 }
  0x2f   :  { %v56_v28 = vadd.f32 %v55_v20, %v48_v10  ;;  %v81_v29 = vrot.slane %v80_v21, 2  ;;  %v70_v34 = vadd.f32 %v69_v26, %v68_v18  ;;  %v120_v39 = vadd.f32 %v119_v31, %v112_v23  ;;  %v616_v17 = vld [vmem:[#allocation5 + $0x30] sm:$0xff] }
  0x30   :  { %v51_v32 = vrot.slane %v50_v24, 2  ;;  %v76_v35 = vadd.f32 %v75_v27, %v74_v19  ;;  %v65_v41 = vrot.slane %v64_v33, 1  ;;  %v115_v46 = vrot.slane %v114_v38, 2 }
  0x31   :  { %v57_v36 = vrot.slane %v56_v28, 2  ;;  %v82_v37 = vadd.f32 %v81_v29, %v80_v21  ;;  %v71_v42 = vrot.slane %v70_v34, 1  ;;  %v121_v47 = vrot.slane %v120_v39, 2 }
  0x32   :  { %v52_v40 = vadd.f32 %v51_v32, %v50_v24  ;;  %v77_v43 = vrot.slane %v76_v35, 1  ;;  %v66_v49 = vadd.f32 %v65_v41, %v64_v33  ;;  %v116_v54 = vadd.f32 %v115_v46, %v114_v38 }
  0x33   :  { %v58_v44 = vadd.f32 %v57_v36, %v56_v28  ;;  %v83_v45 = vrot.slane %v82_v37, 1  ;;  %v72_v50 = vadd.f32 %v71_v42, %v70_v34  ;;  %v122_v55 = vadd.f32 %v121_v47, %v120_v39 }
  0x34   :  { %v53_v48 = vrot.slane %v52_v40, 1  ;;  %v78_v51 = vadd.f32 %v77_v43, %v76_v35  ;;  %v117_v63 = vrot.slane %v116_v54, 1  ;;  %v126_v5 = vadd.f32 %v125_v58, %v579_v8 }
  0x35   :  { %v59_v52 = vrot.slane %v58_v44, 1  ;;  %v84_v53 = vadd.f32 %v83_v45, %v82_v37  ;;  %v93_v57 = vsel %vm87_vm0, %v72_v50, %v66_v49  ;;  %v123_v4 = vrot.slane %v122_v55, 1 }
  0x36   :  { %v54_v56 = vadd.f32 %v53_v48, %v52_v40  ;;  %95 = vst [vmem:[#allocation8 + $0x8] sm:$0x3] %v93_v57  ;;  %v132_v6 = vadd.f32 %v131_v59, %v581_v9  ;;  %v137_v7 = vrot.slane %v586_v12, 4  ;;  %v143_v10 = vrot.slane %v588_v13, 4 }
  0x37   :  { %v60_v61 = vadd.f32 %v59_v52, %v58_v44  ;;  %v98_v62 = vsel %vm87_vm0, %v84_v53, %v78_v51  ;;  %v118_v19 = vadd.f32 %v117_v63, %v116_v54  ;;  %v124_v20 = vadd.f32 %v123_v4, %v122_v55  ;;  %v642_v52 = vld [vmem:[#allocation5 + $0x18] sm:$0xff] }
  0x38   :  { %100 = vst [vmem:[#allocation8 + $0x10] sm:$0x3] %v98_v62  ;;  %v623_v21 = vmax.f32 %v107_v14, %v605_v60  ;;  %v127_v22 = vrot.slane %v126_v5, 2  ;;  %v133_v23 = vrot.slane %v132_v6, 2  ;;  %v138_v24 = vadd.f32 %v137_v7, %v586_v12  ;;  %v646_v62 = vld [vmem:[#allocation2 + $0x18] sm:$0xff] }
  0x39   :  { %v88_v18 = vsel %vm87_vm0, %v60_v61, %v54_v56  ;;  %v144_v25 = vadd.f32 %v143_v10, %v588_v13  ;;  %v151_v26 = vsel %vm87_vm0, %v124_v20, %v118_v19  ;;  %v632_v27 = vmax.f32 %v108_v15, %v612_v11  ;;  %v648_v63 = vld [vmem:[#allocation5 + $0x38] sm:$0xff] }
  0x3a   :  { %90 = vst [vmem:[#allocation8] sm:$0x3] %v88_v18  ;;  %v174_v28 = vmul.f32 %v614_v16, %v605_v60  ;;  %v175_v14 = vmul.f32 %v616_v17, %v612_v11  ;;  %153 = vst [vmem:[#allocation8 + $0x2] sm:$0x3] %v151_v26  ;;  %v128_v29 = vadd.f32 %v127_v22, %v126_v5  ;;  %v139_v31 = vrot.slane %v138_v24, 2  ;;  %v655_v22 = vld [vmem:[#allocation2 + $0x38] sm:$0xff] }
  0x3b   :  { %v134_v30 = vadd.f32 %v133_v23, %v132_v6  ;;  %v145_v32 = vrot.slane %v144_v25, 2  ;;  %v188_v35 = vrot.slane %v605_v60, 4  ;;  %v194_v36 = vrot.slane %v612_v11, 4 }
  0x3c   :  { %v176_v33 = vrot.slane %v174_v28, 4  ;;  %v182_v34 = vrot.slane %v175_v14, 4  ;;  %v129_v37 = vrot.slane %v128_v29, 1  ;;  %v140_v38 = vadd.f32 %v139_v31, %v138_v24 }
  0x3d   :  { %v135_v15 = vrot.slane %v134_v30, 1  ;;  %v146_v39 = vadd.f32 %v145_v32, %v144_v25  ;;  %v189_v42 = vadd.f32 %v188_v35, %v605_v60  ;;  %v195_v43 = vadd.f32 %v194_v36, %v612_v11 }
  0x3e   :  { %v177_v40 = vadd.f32 %v176_v33, %v174_v28  ;;  %v183_v41 = vadd.f32 %v182_v34, %v175_v14  ;;  %v130_v44 = vadd.f32 %v129_v37, %v128_v29  ;;  %v141_v46 = vrot.slane %v140_v38, 1 }
  0x3f   :  { %v136_v45 = vadd.f32 %v135_v15, %v134_v30  ;;  %v147_v47 = vrot.slane %v146_v39, 1  ;;  %v190_v50 = vrot.slane %v189_v42, 2  ;;  %v196_v51 = vrot.slane %v195_v43, 2 }
  0x40   :  { %v178_v48 = vrot.slane %v177_v40, 2  ;;  %v184_v49 = vrot.slane %v183_v41, 2  ;;  %v142_v54 = vadd.f32 %v141_v46, %v140_v38  ;;  %v200_v56 = vrot.slane %v614_v16, 4 }
  0x41   :  { %v156_v53 = vsel %vm87_vm0, %v136_v45, %v130_v44  ;;  %v148_v55 = vadd.f32 %v147_v47, %v146_v39  ;;  %v191_v59 = vadd.f32 %v190_v50, %v189_v42  ;;  %v197_v61 = vadd.f32 %v196_v51, %v195_v43 }
  0x42   :  { %158 = vst [vmem:[#allocation8 + $0xa] sm:$0x3] %v156_v53  ;;  %v179_v57 = vadd.f32 %v178_v48, %v177_v40  ;;  %v185_v58 = vadd.f32 %v184_v49, %v183_v41  ;;  %v201_v5 = vadd.f32 %v200_v56, %v614_v16  ;;  %v206_v6 = vrot.slane %v616_v17, 4 }
  0x43   :  { %v161_v4 = vsel %vm87_vm0, %v148_v55, %v142_v54  ;;  %v237_v7 = vmul.f32 %v642_v52, %v646_v62  ;;  %v192_v19 = vrot.slane %v191_v59, 1  ;;  %v198_v20 = vrot.slane %v197_v61, 1 }
  0x44   :  { %163 = vst [vmem:[#allocation8 + $0x12] sm:$0x3] %v161_v4  ;;  %v180_v10 = vrot.slane %v179_v57, 1  ;;  %v186_v18 = vrot.slane %v185_v58, 1  ;;  %v202_v23 = vrot.slane %v201_v5, 2  ;;  %v207_v24 = vadd.f32 %v206_v6, %v616_v17 }
  0x45   :  { %v238_v25 = vmul.f32 %v648_v63, %v655_v22  ;;  %v239_v26 = vrot.slane %v237_v7, 4  ;;  %v193_v29 = vadd.f32 %v192_v19, %v191_v59  ;;  %v199_v30 = vadd.f32 %v198_v20, %v197_v61 }
  0x46   :  { %v181_v28 = vadd.f32 %v180_v10, %v179_v57  ;;  %v187_v14 = vadd.f32 %v186_v18, %v185_v58  ;;  %v203_v31 = vadd.f32 %v202_v23, %v201_v5  ;;  %v208_v32 = vrot.slane %v207_v24, 2 }
  0x47   :  { %v240_v33 = vadd.f32 %v239_v26, %v237_v7  ;;  %v245_v34 = vrot.slane %v238_v25, 4  ;;  %v219_v36 = vsel %vm87_vm0, %v199_v30, %v193_v29  ;;  %v251_v37 = vrot.slane %v646_v62, 4 }
  0x48   :  { %v214_v35 = vsel %vm87_vm0, %v187_v14, %v181_v28  ;;  %v257_v15 = vrot.slane %v655_v22, 4  ;;  %221 = vst [vmem:[#allocation8 + $0xc] sm:$0x3] %v219_v36  ;;  %v204_v38 = vrot.slane %v203_v31, 1  ;;  %v209_v39 = vadd.f32 %v208_v32, %v207_v24 }
  0x49   :  { %216 = vst [vmem:[#allocation8 + $0x4] sm:$0x3] %v214_v35  ;;  %v241_v40 = vrot.slane %v240_v33, 2  ;;  %v246_v41 = vadd.f32 %v245_v34, %v238_v25  ;;  %v252_v42 = vadd.f32 %v251_v37, %v646_v62  ;;  %v263_v44 = vrot.slane %v642_v52, 4 }
  0x4a   :  { %v258_v43 = vadd.f32 %v257_v15, %v655_v22  ;;  %v269_v45 = vrot.slane %v648_v63, 4  ;;  %v205_v46 = vadd.f32 %v204_v38, %v203_v31  ;;  %v210_v47 = vrot.slane %v209_v39, 1 }
  0x4b   :  { %v242_v48 = vadd.f32 %v241_v40, %v240_v33  ;;  %v247_v49 = vrot.slane %v246_v41, 2  ;;  %v253_v50 = vrot.slane %v252_v42, 2  ;;  %v264_v53 = vadd.f32 %v263_v44, %v642_v52 }
  0x4c   :  { %v259_v51 = vrot.slane %v258_v43, 2  ;;  %v270_v54 = vadd.f32 %v269_v45, %v648_v63  ;;  %v211_v55 = vadd.f32 %v210_v47, %v209_v39  ;;  %v109_v58 = vmax.f32 %v570_v2, %v586_v12 }
  0x4d   :  { %v243_v56 = vrot.slane %v242_v48, 1  ;;  %v248_v57 = vadd.f32 %v247_v49, %v246_v41  ;;  %v254_v59 = vadd.f32 %v253_v50, %v252_v42  ;;  %v265_v4 = vrot.slane %v264_v53, 2 }
  0x4e   :  { %v260_v61 = vadd.f32 %v259_v51, %v258_v43  ;;  %v271_v5 = vrot.slane %v270_v54, 2  ;;  %v224_v6 = vsel %vm87_vm0, %v211_v55, %v205_v46  ;;  %v110_v18 = vmax.f32 %v572_v3, %v588_v13 }
  0x4f   :  { %v244_v7 = vadd.f32 %v243_v56, %v242_v48  ;;  %v249_v10 = vrot.slane %v248_v57, 1  ;;  %226 = vst [vmem:[#allocation8 + $0x14] sm:$0x3] %v224_v6  ;;  %v255_v19 = vrot.slane %v254_v59, 1  ;;  %v266_v23 = vadd.f32 %v265_v4, %v264_v53 }
  0x50   :  { %v261_v20 = vrot.slane %v260_v61, 1  ;;  %v272_v24 = vadd.f32 %v271_v5, %v270_v54  ;;  %v172_v26 = vmax.f32 %v109_v58, %v614_v16  ;;  %v173_v28 = vmax.f32 %v110_v18, %v616_v17 }
  0x51   :  { %v250_v25 = vadd.f32 %v249_v10, %v248_v57  ;;  %v679_v14 = vmax.f32 %v623_v21, %v646_v62  ;;  %v256_v29 = vadd.f32 %v255_v19, %v254_v59  ;;  %v267_v31 = vrot.slane %v266_v23, 1 }
  0x52   :  { %v262_v30 = vadd.f32 %v261_v20, %v260_v61  ;;  %v273_v32 = vrot.slane %v272_v24, 1  ;;  %v684_v34 = vmax.f32 %v632_v27, %v655_v22  ;;  %v235_v35 = vmax.f32 %v172_v26, %v642_v52 }
  0x53   :  { %v277_v33 = vsel %vm87_vm0, %v250_v25, %v244_v7  ;;  %v236_v36 = vmax.f32 %v173_v28, %v648_v63  ;;  %v268_v37 = vadd.f32 %v267_v31, %v266_v23  ;;  %v292_v38 = vsub.f32 %v646_v62, %v679_v14 }
  0x54   :  { %279 = vst [vmem:[#allocation8 + $0x6] sm:$0x3] %v277_v33  ;;  %v282_v21 = vsel %vm87_vm0, %v262_v30, %v256_v29  ;;  %v274_v15 = vadd.f32 %v273_v32, %v272_v24  ;;  %v293_v39 = vsub.f32 %v655_v22, %v684_v34  ;;  %v302_v27 = vsub.f32 %v605_v60, %v679_v14 }
  0x55   :  { %284 = vst [vmem:[#allocation8 + $0xe] sm:$0x3] %v282_v21  ;;  %v303_v52 = vsub.f32 %v612_v11, %v684_v34  ;;  %vm310_vm1 = vcmp.eq.f32.partialorder %v614_v16, %v235_v35  ;;  %v294_v40 = vmul.f32 1.442695, %v292_v38  ;;  %vm311_vm2 = vcmp.eq.f32.partialorder %v616_v17, %v236_v36 }
  0x56   :  { %v287_v63 = vsel %vm87_vm0, %v274_v15, %v268_v37  ;;  %v312_v41 = vsel %vm310_vm1, %v605_v60, %v646_v62  ;;  %v296_v42 = vmul.f32 1.442695, %v293_v39  ;;  %v304_v43 = vmul.f32 1.442695, %v302_v27 }
  0x57   :  { %289 = vst [vmem:[#allocation8 + $0x16] sm:$0x3] %v287_v63  ;;  %v306_v44 = vmul.f32 1.442695, %v303_v52  ;;  %v313_v16 = vsel %vm311_vm2, %v612_v11, %v655_v22  ;;  %394 = vpow2.f32 %v294_v40  ;;  %v318_v45 = vsub.f32 %v579_v8, %v679_v14 }
  0x58   :  { %v319_v46 = vsub.f32 %v581_v9, %v684_v34  ;;  %vm326_vm3 = vcmp.eq.f32.partialorder %v586_v12, %v235_v35 }
  0x59   :  { %469 = shalt.err (!%p466_p6)
}
  0x5a   :  { %s470_s14 = scalar_lea.hbm %s761_s3, 384 }
  0x5b   :  { %p471_p7 = scmp.ne.s32.totalorder %s761_s3, %s470_s14  ;;  %p474_p8 = scmp.lt.u32.totalorder %s470_s14, %s761_s3 }
  0x5d   :  { %p476_p9 = pnand %p474_p8, %p471_p7 }
  0x5f   :  { %479 = shalt.err (!%p476_p9)
}
  0x60   :  { %377 = dma.vmem_to_hbm [thread:$0]  %s698_s10, 384, %s761_s3, [#allocation9], %s511_s22, %s511_s22, %s512_s23   ;;  %396 = vpow2.f32 %v296_v42  ;;  %vm327_vm4 = vcmp.eq.f32.partialorder %v588_v13, %v236_v36  ;;  %v328_v60 = vsel %vm326_vm3, %v579_v8, %v312_v41  ;;  %v334_v11 = vsub.f32 %v566_v0, %v679_v14 }
  0x61   :  { %398 = vpow2.f32 %v304_v43  ;;  %v320_v17 = vmul.f32 1.442695, %v318_v45  ;;  %v322_v62 = vmul.f32 1.442695, %v319_v46  ;;  %v329_v22 = vsel %vm327_vm4, %v581_v9, %v313_v16  ;;  %v395_v49 = vpop.eup %394  ;;  %s515_s3 = smov [#allocation7]  }
  0x62   :  { %400 = vpow2.f32 %v306_v44  ;;  %v335_v47 = vsub.f32 %v568_v1, %v684_v34  ;;  %v336_v48 = vmul.f32 1.442695, %v334_v11  ;;  %vm342_vm5 = vcmp.eq.f32.partialorder %v570_v2, %v235_v35  ;;  %s362_s21 = sshll.u32 %s515_s3, 4  ;;  %s363_s21 = int_to_ptr.vmem [resolvable:$true] %s362_s21 }
  0x63   :  { %402 = vpow2.f32 %v320_v17  ;;  %vm343_vm6 = vcmp.eq.f32.partialorder %v572_v3, %v236_v36  ;;  %v344_v8 = vsel %vm342_vm5, %v566_v0, %v328_v60  ;;  %s480_s22 = scalar_lea.vmem %s363_s21, 128  ;;  %p485_p11 = scmp.lt.s32.totalorder %s363_s21, %s363_s21 }
  0x64   :  { %404 = vpow2.f32 %v322_v62  ;;  %v338_v12 = vmul.f32 1.442695, %v335_v47  ;;  %v345_v13 = vsel %vm343_vm6, %v568_v1, %v329_v22  ;;  %p481_p10 = scmp.ne.s32.totalorder %s363_s21, %s480_s22  ;;  %p486_p12 = scmp.lt.s32.totalorder %s480_s22, %s480_s22 }
  0x65   :  { %406 = vpow2.f32 %v336_v48 }
  0x66   :  { %408 = vpow2.f32 %v338_v12  ;;  %p487_p13 = por %p486_p12, %p485_p11 }
  0x68   :  { %p488_p0 = pnand %p487_p13, %p481_p10 }
  0x6a   :  { %v397_v9 = vpop.eup %396 }
  0x6b   :  { %v399_v50 = vpop.eup %398 }
  0x6c   :  { %v401_v51 = vpop.eup %400  ;;  %v308_v53 = vadd.f32 %v399_v50, %v395_v49 }
  0x6d   :  { %v403_v54 = vpop.eup %402  ;;  %v309_v55 = vadd.f32 %v401_v51, %v397_v9 }
  0x6e   :  { %v405_v56 = vpop.eup %404  ;;  %v324_v2 = vadd.f32 %v403_v54, %v308_v53 }
  0x6f   :  { %v407_v57 = vpop.eup %406  ;;  %v325_v58 = vadd.f32 %v405_v56, %v309_v55 }
  0x70   :  { %v409_v3 = vpop.eup %408  ;;  %v340_v59 = vadd.f32 %v407_v57, %v324_v2 }
  0x71   :  { %v341_v0 = vadd.f32 %v409_v3, %v325_v58 }
  0x72   :  { %410 = vlog2.f32 %v340_v59 }
  0x73   :  { %412 = vlog2.f32 %v341_v0 }
  0x7c   :  { %v411_v61 = vpop.eup %410 }
  0x7d   :  { %v413_v1 = vpop.eup %412  ;;  %v347_v4 = vmul.f32 0.6931472, %v411_v61 }
  0x7e   :  { %v349_v5 = vmul.f32 0.6931472, %v413_v1 }
  0x7f   :  { %v350_v6 = vadd.f32 %v347_v4, %v679_v14 }
  0x80   :  { %v351_v7 = vadd.f32 %v349_v5, %v684_v34 }
  0x81   :  { %v352_v10 = vsub.f32 %v350_v6, %v344_v8 }
  0x82   :  { %v353_v18 = vsub.f32 %v351_v7, %v345_v13 }
  0x84   :  { %v354_v19 = vadd.f32 %v353_v18, %v352_v10 }
  0x86   :  { %355 = vst [vmem:[#allocation7] sm:$0xff] %v354_v19 }
  0x87   :  { %491 = shalt.err (!%p488_p0)
}
  0x88   :  { %s492_s25 = scalar_lea.hbm %s760_s2, 128 }
  0x89   :  { %p493_p1 = scmp.ne.s32.totalorder %s760_s2, %s492_s25  ;;  %p496_p2 = scmp.lt.u32.totalorder %s492_s25, %s760_s2 }
  0x8b   :  { %p498_p3 = pnand %p496_p2, %p493_p1 }
  0x8d   :  { %501 = shalt.err (!%p498_p3)
}
  0x8e   :  { %365 = dma.vmem_to_hbm [thread:$0]  %s363_s21, 128, %s760_s2, [#allocation4]  }
  0x8f   :  { %506 = dma.done.wait [#allocation4], 128  }
  0x90   :  { %507 = vsyncadd [#allocation4], 4294967168 }
  0x91   :  { %508 = dma.done.wait [#allocation9], 384  }
  0x92   :  { %509 = vsyncadd [#allocation9], 4294966912 }
  0x93   :  { %384 = vsyncpa [#allocation3], 1 }
  0x94   :  { %385 = vsyncpa [#allocation6], 1 }
  0x95   :  { %386 = vsyncpa [#allocation4], 1 }
  0x96   :  { %387 = vsyncpa [#allocation9], 1 }

</bundles_post_ra>
